<compile_context>
chip_gen: v6e
topology: v6e:2x2x1
jax: 0.10.0
libtpu: 0.0.40
codegen_flags: <defaults>
</compile_context>

<pallas_src>
import jax
import jax.numpy as jnp
from jax.experimental import pallas as pl
from jax.experimental.pallas import tpu as pltpu


def _round_up(x, m):
    return ((x + m - 1) // m) * m


def _vmem_budget_bytes():
    """~75% of physical VMEM: v7x (64 MiB) -> ~48 MiB, v5e/v6e (128 MiB) -> ~96 MiB."""
    cap = 64 * 1024 * 1024
    try:
        info = pltpu.get_tpu_info()
        cap = getattr(info, "vmem_capacity_bytes", None) or cap
    except Exception:
        pass
    return int(cap) * 3 // 4


def mlp_decoder_kernel(z_ref, w3_ref, b3_ref, w4_ref, b4_ref, out_ref):
    # Layer 1: recomputed per (flat, batch) tile -- K = latent is tiny, and
    # recompute keeps both grid axes "parallel" (no serializing scratch).
    h3 = jnp.dot(z_ref[...], w3_ref[...], preferred_element_type=jnp.float32)
    h3 = jnp.maximum(h3 + b3_ref[...], 0.0)                     # f32 epilogue

    # Layer 2: bf16 MXU operands, f32 accumulation.
    o = jnp.dot(h3.astype(w4_ref.dtype), w4_ref[...],
                preferred_element_type=jnp.float32)
    o = o + b4_ref[...]

    # sigmoid(o) = 0.5 + 0.5*tanh(0.5*o): one EUP transcendental per element,
    # exact [0,1] range, no exp overflow for large-magnitude logits.
    out_ref[...] = (0.5 + 0.5 * jnp.tanh(0.5 * o)).astype(out_ref.dtype)


def prepare_decoder_params(w3, b3, w4, b4, output_shape, *,
                           max_batch_tile=256, out_dtype=jnp.float32):
    """One-time weight pad + bf16 cast (hoisted out of the per-call path) and
    VMEM-budgeted tile-size derivation."""
    latent, hidden = w3.shape
    C, H, W = output_shape
    flat = H * W
    assert w4.shape == (hidden, flat) and b4.shape[-1] == flat

    flat_128 = _round_up(flat, 128)
    out_isz = jnp.dtype(out_dtype).itemsize
    TB_max = max_batch_tile

    budget = _vmem_budget_bytes()
    # Per-step VMEM (double-buffered pipeline), as a function of flat tile TN:
    #   W4 tile : 2 * hidden * TN * 2B     (bf16, streamed once per flat tile)
    #   b4 tile : 2 * TN * 4B
    #   out tile: 2 * TB * TN * out_isz
    #   z tile  : 2 * TB * latent * 2B
    #   W3 / b3 : 2 * (latent*hidden*2B + hidden*4B)   (resident)
    fixed = 2 * (latent * hidden * 2 + hidden * 4) + 2 * TB_max * latent * 2
    per_tn = 2 * (hidden * 2 + 4 + TB_max * out_isz)
    tn_budget = max(128, ((budget - fixed) // per_tn) // 128 * 128)
    TN = min(tn_budget, flat_128)
    # Guarantee >=2 flat tiles when possible so a parallel axis feeds both
    # v7x TensorCores (no extra W4 traffic under the swapped grid order).
    if TN >= flat_128 and flat_128 >= 256:
        TN = _round_up(flat_128 // 2, 128)
    F_pad = _round_up(flat, TN)

    w3_b = jnp.asarray(w3).astype(jnp.bfloat16)
    b3_f = jnp.asarray(b3, jnp.float32).reshape(1, hidden)
    w4_p = jnp.zeros((hidden, F_pad), jnp.bfloat16).at[:, :flat].set(
        jnp.asarray(w4).astype(jnp.bfloat16))
    b4_p = jnp.zeros((1, F_pad), jnp.float32).at[:, :flat].set(
        jnp.asarray(b4, jnp.float32).reshape(1, flat))

    return dict(w3=w3_b, b3=b3_f, w4=w4_p, b4=b4_p,
                latent=latent, hidden=hidden, flat=flat,
                F_pad=F_pad, TN=TN, TB_max=TB_max,
                out_dtype=out_dtype, output_shape=tuple(output_shape),
                vmem_limit=int(budget))


def mlp_decoder_forward(z, params):
    """z: (B, latent). Returns (-1, C, H, W) like the PyTorch module forward."""
    latent, hidden = params["latent"], params["hidden"]
    flat, F_pad, TN = params["flat"], params["F_pad"], params["TN"]
    out_dtype = params["out_dtype"]
    C, H, W = params["output_shape"]

    B = z.shape[0]
    TB = min(params["TB_max"], _round_up(B, 16))   # bf16 sublane-pair multiple
    B_pad = _round_up(B, TB)
    z_p = jnp.zeros((B_pad, latent), jnp.bfloat16).at[:B].set(
        z.astype(jnp.bfloat16))

    n_flat = F_pad // TN
    n_batch = B_pad // TB
    # Batch is the innermost (fastest) grid axis: W4/b4 block indices are
    # constant across the inner sweep -> each W4 N-tile read from HBM once.
    grid = (n_flat, n_batch)

    cost = pl.CostEstimate(
        flops=2 * B_pad * latent * hidden * n_flat   # layer-1 recompute per flat tile
              + 2 * B_pad * hidden * F_pad,
        transcendentals=B_pad * F_pad,               # one tanh per element
        bytes_accessed=(n_flat * z_p.size * 2        # z re-read per flat tile
                        + params["w3"].size * 2 + params["b3"].size * 4
                        + params["w4"].size * 2 + params["b4"].size * 4
                        + B_pad * F_pad * jnp.dtype(out_dtype).itemsize),
    )

    out_flat = pl.pallas_call(
        mlp_decoder_kernel,
        out_shape=jax.ShapeDtypeStruct((B_pad, F_pad), out_dtype),
        grid_spec=pltpu.PrefetchScalarGridSpec(
            num_scalar_prefetch=0,
            grid=grid,
            in_specs=[
                pl.BlockSpec((TB, latent), lambda j, i: (i, 0)),      # z streams (inner axis)
                pl.BlockSpec((latent, hidden), lambda j, i: (0, 0)),  # W3 resident
                pl.BlockSpec((1, hidden), lambda j, i: (0, 0)),       # b3 resident
                pl.BlockSpec((hidden, TN), lambda j, i: (0, j)),      # W4 N-tile: once per j
                pl.BlockSpec((1, TN), lambda j, i: (0, j)),           # b4 N-tile
            ],
            out_specs=pl.BlockSpec((TB, TN), lambda j, i: (i, j)),
        ),
        compiler_params=pltpu.CompilerParams(
            dimension_semantics=("parallel", "parallel"),
            vmem_limit_bytes=params["vmem_limit"],
        ),
        cost_estimate=cost,
    )(z_p, params["w3"], params["b3"], params["w4"], params["b4"])

    # Slice batch/flat padding; keep the kernel's output dtype (no forced
    # f32 upcast), then torch's out.view(-1, C, H, W).
    return out_flat[:B, :flat].reshape(-1, C, H, W)


def init_params(key, latent_space_size, hidden_layer_size, flat_size):
    """Deterministic init mimicking nn.Linear default (uniform +/- 1/sqrt(fan_in))."""
    k3w, k3b, k4w, k4b = jax.random.split(key, 4)
    bound3 = 1.0 / jnp.sqrt(latent_space_size)
    bound4 = 1.0 / jnp.sqrt(hidden_layer_size)
    # stored as (in, out) so the kernel does x @ W
    w3 = jax.random.uniform(k3w, (latent_space_size, hidden_layer_size),
                            jnp.float32, -bound3, bound3)
    b3 = jax.random.uniform(k3b, (1, hidden_layer_size), jnp.float32, -bound3, bound3)
    w4 = jax.random.uniform(k4w, (hidden_layer_size, flat_size),
                            jnp.float32, -bound4, bound4)
    b4 = jax.random.uniform(k4b, (1, flat_size), jnp.float32, -bound4, bound4)
    return w3, b3, w4, b4


if __name__ == "__main__":
    # Small shapes consistent with the module: output_shape = (C, H, W)
    output_shape = (1, 16, 16)          # flat_size = 256
    latent_space_size = 8
    hidden_layer_size = 32
    batch = 2

    key = jax.random.PRNGKey(0)
    kz, kp = jax.random.split(key)
    z = jax.random.normal(kz, (batch, latent_space_size), jnp.float32)
    w3, b3, w4, b4 = init_params(kp, latent_space_size, hidden_layer_size,
                                 output_shape[1] * output_shape[2])

    params = prepare_decoder_params(w3, b3, w4, b4, output_shape)
    out = mlp_decoder_forward(z, params)
    out = jax.block_until_ready(out)

    # Reference check in plain f32 JAX. Tolerance covers bf16 MXU operands
    # (the tanh-based sigmoid itself is exact).
    h_ref = jnp.maximum(z @ w3 + b3, 0.0)
    o_ref = jax.nn.sigmoid(h_ref @ w4 + b4).reshape(-1, *output_shape)
    assert out.shape == (batch, *output_shape), out.shape
    assert jnp.allclose(out, o_ref, atol=1e-2), "mismatch vs reference"

    print("KERNEL_OK")
</pallas_src>

<mosaic_0001>
module attributes {stable_mosaic.version = 11 : i64} {
  func.func @mlp_decoder_kernel(%arg0: i32, %arg1: i32, %arg2: memref<16x8xbf16, #tpu.memory_space<vmem>>, %arg3: memref<8x32xbf16, #tpu.memory_space<vmem>>, %arg4: memref<1x32xf32, #tpu.memory_space<vmem>>, %arg5: memref<32x128xbf16, #tpu.memory_space<vmem>>, %arg6: memref<1x128xf32, #tpu.memory_space<vmem>>, %arg7: memref<16x128xf32, #tpu.memory_space<vmem>>) attributes {dimension_semantics = [#tpu.dimension_semantics<parallel>, #tpu.dimension_semantics<parallel>], iteration_bounds = array<i64: 2, 1>, scalar_prefetch = 0 : i64, scratch_operands = 0 : i64, tpu.core_type = #tpu.core_type<tc>, window_params = [{transform_indices = @transform_0, window_bounds = array<i64: 16, 8>}, {pipeline_mode = #tpu.pipeline_mode<synchronous>, transform_indices = @transform_1, window_bounds = array<i64: 8, 32>}, {pipeline_mode = #tpu.pipeline_mode<synchronous>, transform_indices = @transform_2, window_bounds = array<i64: 1, 32>}, {transform_indices = @transform_3, window_bounds = array<i64: 32, 128>}, {transform_indices = @transform_4, window_bounds = array<i64: 1, 128>}, {transform_indices = @transform_5, window_bounds = array<i64: 16, 128>}]} {
    %c0 = arith.constant 0 : index
    %c0_0 = arith.constant 0 : index
    %0 = vector.load %arg2[%c0, %c0_0] : memref<16x8xbf16, #tpu.memory_space<vmem>>, vector<16x8xbf16>
    %c0_1 = arith.constant 0 : index
    %c0_2 = arith.constant 0 : index
    %1 = vector.load %arg3[%c0_1, %c0_2] : memref<8x32xbf16, #tpu.memory_space<vmem>>, vector<8x32xbf16>
    %cst = arith.constant dense<0.000000e+00> : vector<16x32xf32>
    %2 = tpu.matmul %0, %1, %cst {dimension_numbers = #tpu.dot_dimension_numbers<[1], [0], [0], [1], [0, 0, 1, 1], [], []>} : vector<16x8xbf16>, vector<8x32xbf16>, vector<16x32xf32> -> vector<16x32xf32>
    %c0_3 = arith.constant 0 : index
    %c0_4 = arith.constant 0 : index
    %3 = vector.load %arg4[%c0_3, %c0_4] : memref<1x32xf32, #tpu.memory_space<vmem>>, vector<1x32xf32>
    %4 = vector.broadcast %3 : vector<1x32xf32> to vector<16x32xf32>
    %5 = arith.addf %2, %4 : vector<16x32xf32>
    %cst_5 = arith.constant 0.000000e+00 : f32
    %6 = vector.broadcast %cst_5 : f32 to vector<16x32xf32>
    %7 = arith.maximumf %5, %6 : vector<16x32xf32>
    %8 = arith.truncf %7 : vector<16x32xf32> to vector<16x32xbf16>
    %c0_6 = arith.constant 0 : index
    %c0_7 = arith.constant 0 : index
    %9 = vector.load %arg5[%c0_6, %c0_7] : memref<32x128xbf16, #tpu.memory_space<vmem>>, vector<32x128xbf16>
    %cst_8 = arith.constant dense<0.000000e+00> : vector<16x128xf32>
    %10 = tpu.matmul %8, %9, %cst_8 {dimension_numbers = #tpu.dot_dimension_numbers<[1], [0], [0], [1], [0, 0, 1, 1], [], []>} : vector<16x32xbf16>, vector<32x128xbf16>, vector<16x128xf32> -> vector<16x128xf32>
    %c0_9 = arith.constant 0 : index
    %c0_10 = arith.constant 0 : index
    %11 = vector.load %arg6[%c0_9, %c0_10] : memref<1x128xf32, #tpu.memory_space<vmem>>, vector<1x128xf32>
    %12 = vector.broadcast %11 : vector<1x128xf32> to vector<16x128xf32>
    %13 = arith.addf %10, %12 : vector<16x128xf32>
    %cst_11 = arith.constant 5.000000e-01 : f32
    %14 = vector.broadcast %cst_11 : f32 to vector<16x128xf32>
    %15 = arith.mulf %14, %13 : vector<16x128xf32>
    %16 = math.tanh %15 : vector<16x128xf32>
    %cst_12 = arith.constant 5.000000e-01 : f32
    %17 = vector.broadcast %cst_12 : f32 to vector<16x128xf32>
    %18 = arith.mulf %17, %16 : vector<16x128xf32>
    %cst_13 = arith.constant 5.000000e-01 : f32
    %19 = vector.broadcast %cst_13 : f32 to vector<16x128xf32>
    %20 = arith.addf %19, %18 : vector<16x128xf32>
    %c0_14 = arith.constant 0 : index
    %c0_15 = arith.constant 0 : index
    %21 = vector.load %arg7[%c0_14, %c0_15] : memref<16x128xf32, #tpu.memory_space<vmem>>, vector<16x128xf32>
    tpu.vector_store %arg7[%c0_14, %c0_15], %20 {strides = array<i32>} : memref<16x128xf32, #tpu.memory_space<vmem>>, vector<16x128xf32>,
    return
  }
  func.func @transform_0(%arg0: i32, %arg1: i32) -> (i32, i32) {
    %c0_i32 = arith.constant 0 : i32
    %c0_i32_0 = arith.constant 0 : i32
    return %arg1, %c0_i32 : i32, i32
  }
  func.func @transform_1(%arg0: i32, %arg1: i32) -> (i32, i32) {
    %c0_i32 = arith.constant 0 : i32
    %c0_i32_0 = arith.constant 0 : i32
    %c0_i32_1 = arith.constant 0 : i32
    return %c0_i32, %c0_i32_0 : i32, i32
  }
  func.func @transform_2(%arg0: i32, %arg1: i32) -> (i32, i32) {
    %c0_i32 = arith.constant 0 : i32
    %c0_i32_0 = arith.constant 0 : i32
    %c0_i32_1 = arith.constant 0 : i32
    return %c0_i32, %c0_i32_0 : i32, i32
  }
  func.func @transform_3(%arg0: i32, %arg1: i32) -> (i32, i32) {
    %c0_i32 = arith.constant 0 : i32
    %c0_i32_0 = arith.constant 0 : i32
    return %c0_i32, %arg0 : i32, i32
  }
  func.func @transform_4(%arg0: i32, %arg1: i32) -> (i32, i32) {
    %c0_i32 = arith.constant 0 : i32
    %c0_i32_0 = arith.constant 0 : i32
    return %c0_i32, %arg0 : i32, i32
  }
  func.func @transform_5(%arg0: i32, %arg1: i32) -> (i32, i32) {
    %c0_i32 = arith.constant 0 : i32
    return %arg1, %arg0 : i32, i32
  }
}

</mosaic_0001>

<bundles_post_ra>
// kernel: tpu_custom_call.1
= control target key start
LH: loop header
LB: loop body
LE: loop exit
PB: predicated region body
PF: predicated region fallthrough
CT: control target
= control target key end

     0   :  { %10 = vsyncpa [#allocation3], 0  ;;  %s991_s0 = inlined_call_operand.vmem [shape: bf16[16,8], index: 0, kind: input, shape index: {}]   ;;  %s992_s1 = inlined_call_operand.vmem [shape: bf16[8,32], index: 1, kind: input, shape index: {}]   ;;  %s993_s2 = inlined_call_operand.vmem [shape: f32[1,32], index: 2, kind: input, shape index: {}]   ;;  %s994_s3 = inlined_call_operand.hbm [shape: bf16[32,256], index: 3, kind: input, shape index: {}]   ;;  %s995_s4 = inlined_call_operand.vmem [shape: f32[1,256], index: 4, kind: input, shape index: {}]   ;;  %s996_s5 = inlined_call_operand.hbm [shape: f32[16,256], index: 5, kind: output, shape index: {}]  }
   0x1   :  { %12 = vsyncpa [#allocation3 + $0x1], 0 }
   0x2   :  { %13 = vsyncpa [#allocation4], 0 }
   0x3   :  { %15 = vsyncpa [#allocation4 + $0x1], 0  ;;  %s829_s18 = smov 0   ;;  %s831_s19 = smov 0  }
   0x4   :  { %s833_s20 = smov 0   ;;  %s835_s21 = smov 0  }
   0x5   :  { %s837_s22 = smov 0   ;;  %s839_s23 = smov 0  }
   0x6 LB: > { %s562_s24 = sadd.s32 4294967295, %s787_s23   ;;  %s563_s25 = sadd.s32 4294967294, %s787_s23   ;;  %s787_s23 = sphi %s839_s23, %s21_s23   ;;  %s783_s22 = sphi %s837_s22, %s1007_s22   ;;  %s779_s21 = sphi %s835_s21, %s1006_s21   ;;  %s775_s20 = sphi %s833_s20, %s1005_s20   ;;  %s771_s19 = sphi %s831_s19, %s1004_s19   ;;  %s767_s18 = sphi %s829_s18, %s1003_s18  }
   0x7   : > { %s33_s26 = sadd.s32 1, %s783_s22  ;;  %s108_s27 = sadd.s32 1, %s775_s20 }
   0x8   : > { %p35_p0 = scmp.ge.s32.totalorder %s33_s26, 2  ;;  %p115_p1 = scmp.ne.s32.totalorder %s775_s20, %s771_s19 }
   0x9   : > { %p116_p2 = scmp.eq.s32.totalorder %s787_s23, 0  ;;  %p121_p3 = scmp.ne.s32.totalorder %s771_s19, %s767_s18 }
   0xa   : > { %s1009_s26 = smov (%p35_p0, %s33_s26), 0  ;;  %p122_p5 = scmp.eq.s32.totalorder %s562_s24, 0 }
   0xb   : > { %p870_p4 = por %p116_p2, %p115_p1  ;;  %s105_s29 = ssub.s32 %s783_s22, %s1009_s26 }
   0xc   : > { %p173_p6 = scmp.eq.s32.totalorder %s562_s24, 1  ;;  %p106_p7 = scmp.eq.s32.totalorder %s105_s29, 0 }
   0xd   : > { %p876_p8 = por %p122_p5, %p121_p3  ;;  %p179_p10 = scmp.eq.s32.totalorder %s563_s25, 1 }
   0xe   : > { %p880_p9 = por %p173_p6, %p115_p1  ;;  %p614_p13 = scmp.lt.s32.totalorder %s787_s23, 2 }
   0xf   : > { %s885_s7 = scalar_select %p106_p7, %s775_s20, %s108_s27  }
  0x10   : > { %p887_p11 = por %p179_p10, %p121_p3  ;;  %s214_s9 = sand.u32 1, %s775_s20  }
  0x11   : > { %s567_s10 = sshll.u32 %s214_s9, 4  ;;  %s568_s11 = sshll.u32 %s783_s22, 6 }
  0x12   : > { %s223_s14 = scalar_lea.hbm %s994_s3, %s568_s11  ;;  %s218_s15 = scalar_lea.vmem [#allocation2], %s567_s10 }
  0x13   : > { %s224_s16 = sshll.u32 %s218_s15, 4  ;;  %p900_p0 = pnand %p614_p13, %p870_p4  ;;  %s225_s16 = int_to_ptr.vmem [resolvable:$true] %s224_s16 }
  0x14   : > { %s215_s24 = scalar_lea.sflag [#allocation3], %s214_s9  ;;  %s692_s25 = scalar_lea.vmem %s225_s16, 256 }
  0x15   : > { %p681_p1 = pneg %p900_p0  ;;  %p693_p2 = scmp.ne.s32.totalorder %s225_s16, %s692_s25 }
  0x16   : > { %s789_s27 = smov [#allocation2]  }
  0x17   : > { %p695_p3 = pnand %p693_p2, %p681_p1  ;;  %s697_s29 = sshll.u32 %s789_s27, 4  ;;  %s698_s29 = int_to_ptr.vmem [resolvable:$false] %s697_s29 }
  0x18   : > { %s699_s11 = scalar_lea.vmem %s698_s29, 512  ;;  %p700_p6 = scmp.lt.s32.totalorder %s225_s16, %s698_s29 }
  0x19   : > { %p696_p5 = pneg %p695_p3  ;;  %p701_p7 = scmp.lt.s32.totalorder %s699_s11, %s692_s25 }
  0x1b   : > { %p702_p10 = por %p701_p7, %p700_p6 }
  0x1d   : > { %p703_p12 = pnand %p702_p10, %p696_p5 }
  0x1f   : > { %706 = shalt.err (!%p703_p12)
}
  0x20   : > { %s790_s28 = smov 128   ;;  %s791_s9 = smov 64  }
  0x21   : > { %s792_s10 = smov 4   ;;  %p569_p4 = scmp.ge.s32.totalorder %s787_s23, 1 }
  0x22   : > { %609 = dma.hbm_to_vmem [thread:$0]  (!%p900_p0), %s223_s14, 256, %s225_s16, %s215_s24, %s790_s28, %s791_s9, %s792_s10  }
  0x23   : > { %p238_p13 = scmp.lt.s32.totalorder %s787_s23, 3 }
  0x25   : > { %p239_p1 = pnand %p569_p4, %p238_p13 }
  0x26   : > { %s911_s12 = sand.u32 (!%p239_p1), 1, %s771_s19  }
  0x27   : > { %242 = sbr.rel (%p239_p1) target bundleno = 488 (0x1e8), region = 40  ;;  %s570_s13 = sshll.u32 (!%p239_p1), %s911_s12, 4 }
  0x28   : > { %s245_s15 = scalar_lea.sflag (!%p239_p1), [#allocation3], %s911_s12  ;;  %s248_s25 = scalar_lea.vmem (!%p239_p1), [#allocation2], %s570_s13 }
  0x2c   : > { %758 = dma.done.wait (%p876_p8), %s245_s15, 256  }
  0x2d   : > { %760 = vsyncadd (%p876_p8), %s245_s15, 4294967040  ;;  %v793_v0 = vmov 0.0   ;;  %vm794_vm0 = vmmov 0   ;;  %vm313_vm1 = vcmask 1043456   ;;  %v296_v1 = vld [vmem:[%s992_s1] sm:$0xf] }
  0x2e   : > { %588 = vmatprep.subr.bf16.mxu0 %v793_v0  ;;  %590 = vmatprep.mubr.msk.bf16.mxu0 %vm794_vm0, %v793_v0  ;;  %v315_v2 = vsel %vm313_vm1, %v296_v1, 0  ;;  %v672_v3 = vld [vmem:[%s991_s0] sm:$0xff]   ;;  %vm309_vm2 = vcmask 64512   ;;  %v673_v4 = vld [vmem:[%s248_s25 + $0x8] sm:$0xff]   ;;  %vm384_vm3 = vcmask 261120   ;;  %p289_p8 = scmp.lt.s32.totalorder %s779_s21, 1 }
  0x2f   : > { %594 = vmatprep.subr.bf16.mxu1 %v793_v0  ;;  %598 = vmatprep.mubr.msk.bf16.mxu1 %vm794_vm0, %v793_v0  ;;  %v674_v5 = vld [vmem:[%s248_s25] sm:$0xff]   ;;  %s282_s10 = scalar_lea.vmem [#allocation5], %s570_s13  ;;  %s580_s25 = sshll.u32 %s779_s21, 7 }
  0x30   : > { %589 = vmatpush3.bf16.msra.mxu0 %v315_v2  ;;  %595 = vmatpush3.bf16.msra.mxu1 %v673_v4  ;;  %v572_v6 = vld [vmem:[%s993_s2] ss:$0 sm:$0xff]  ;;  %s290_s29 = scalar_select %p289_p8, %s779_s21, 1 }
  0x31   : > { %596 = vmatprep.subr.bf16.mxu1 %v793_v0  ;;  %s455_s15 = sshll.u32 %s282_s10, 4  ;;  %s943_s17 = scalar_lea.hbm %s996_s5, %s580_s25  ;;  %s938_s15 = int_to_ptr.vmem [resolvable:$true] %s455_s15 }
  0x32   : > { %s291_s9 = scalar_lea.vmem %s995_s4, %s290_s29  ;;  %s440_s24 = scalar_lea.sflag [#allocation4], %s911_s12 }
  0x33   : > { %591 = vmatmul.mubr.msk.bf16.vlgmr.msra.gmra.mxu0 %vm309_vm2, %v672_v3  ;;  %v575_v16 = vld [vmem:[%s291_s9] ss:$0 sm:$0xff]  ;;  %s707_s13 = scalar_lea.vmem %s938_s15, 256  ;;  %s795_s21 = smov [#allocation5]  }
  0x34   : > { %597 = vmatpush3.bf16.msra.mxu1 %v674_v5  ;;  %p708_p12 = scmp.ne.s32.totalorder %s938_s15, %s707_s13  ;;  %s711_s30 = sshll.u32 %s795_s21, 4  ;;  %s712_s30 = int_to_ptr.vmem [resolvable:$false] %s711_s30 }
  0x35   : > { %s713_s27 = scalar_lea.vmem %s712_s30, 512  ;;  %p714_p3 = scmp.lt.s32.totalorder %s938_s15, %s712_s30 }
  0x36   : > { %p709_p0 = pnand %p708_p12, %p880_p9  ;;  %p715_p5 = scmp.lt.s32.totalorder %s713_s27, %s707_s13 }
  0x38   : > { %p710_p2 = pneg %p709_p0  ;;  %p716_p6 = por %p715_p5, %p714_p3 }
  0x3a   : > { %p717_p7 = pnand %p716_p6, %p710_p2 }
  0xf3   : > { %v351_v7 = vpop.f32.mrf.mxu0 }
  0xf4   : > { %v352_v9 = vadd.f32 %v572_v6, %v351_v7 }
  0xf5   : > { %v592_v8 = vpop.f32.mrf.mxu0 }
  0xf6   : > { %v358_v13 = vmax.f32 %v352_v9, 0.0 }
  0xf7   : > { %v354_v10 = vpop.f32.mrf.mxu0 }
  0xf8   : > { %v355_v11 = vadd.f32 %v572_v6, %v354_v10 }
  0xf9   : > { %v593_v12 = vpop.f32.mrf.mxu0 }
  0xfa   : > { %v359_v14 = vmax.f32 %v355_v11, 0.0 }
  0xfc   : > { %v360_v15 = vpack.c.bf16 %v359_v14, %v358_v13 }
  0xfe   : > { %599 = vmatmul.mubr.msk.bf16.vlgmr.msra.gmra.mxu1 %vm384_vm3, %v360_v15 }
 0x1be   : > { %v422_v17 = vpop.f32.mrf.mxu1 }
 0x1bf   : > { %v423_v18 = vadd.f32 %v575_v16, %v422_v17 }
 0x1c0   : > { %v600_v19 = vpop.f32.mrf.mxu1 }
 0x1c1   : > { %v429_v20 = vmul.f32 0.5, %v423_v18 }
 0x1c2   : > { %v425_v21 = vpop.f32.mrf.mxu1 }
 0x1c3   : > { %675 = vtanh.f32 %v429_v20  ;;  %v426_v22 = vadd.f32 %v575_v16, %v425_v21 }
 0x1c4   : > { %v601_v23 = vpop.f32.mrf.mxu1 }
 0x1c5   : > { %v430_v24 = vmul.f32 0.5, %v426_v22 }
 0x1c7   : > { %677 = vtanh.f32 %v430_v24 }
 0x1d0   : > { %v676_v25 = vpop.eup %675 }
 0x1d1   : > { %v433_v26 = vmul.f32 0.5, %v676_v25 }
 0x1d3   : > { %v435_v27 = vadd.f32 0.5, %v433_v26 }
 0x1d4   : > { %v678_v28 = vpop.eup %677 }
 0x1d5   : > { %437 = vst [vmem:[%s282_s10] sm:$0xff] %v435_v27  ;;  %v434_v29 = vmul.f32 0.5, %v678_v28 }
 0x1d7   : > { %v436_v30 = vadd.f32 0.5, %v434_v29 }
 0x1d9   : > { %438 = vst [vmem:[%s282_s10 + $0x8] sm:$0xff] %v436_v30 }
 0x1da   : > { %720 = shalt.err (!%p717_p7)
}
 0x1db   : > { %s721_s29 = scalar_lea.hbm %s943_s17, 256  ;;  %s725_s9 = scalar_lea.hbm %s996_s5, 512 }
 0x1dc   : > { %p722_p10 = scmp.ne.s32.totalorder %s943_s17, %s721_s29  ;;  %p726_p1 = scmp.lt.s32.totalorder %s943_s17, %s996_s5 }
 0x1dd   : > { %p727_p8 = scmp.lt.s32.totalorder %s725_s9, %s721_s29 }
 0x1de   : > { %p723_p4 = pnand %p722_p10, %p880_p9 }
 0x1df   : > { %p728_p12 = por %p727_p8, %p726_p1 }
 0x1e0   : > { %p724_p13 = pneg %p723_p4 }
 0x1e2   : > { %p729_p0 = pnand %p728_p12, %p724_p13 }
 0x1e4   : > { %732 = shalt.err (!%p729_p0)
}
 0x1e5   : > { %s796_s14 = smov 128   ;;  %s797_s16 = smov 256  }
 0x1e6   : > { %s798_s13 = smov 8  }
 0x1e7   : > { %604 = dma.vmem_to_hbm [thread:$0]  (%p880_p9), %s938_s15, 256, %s943_s17, %s440_s24, %s796_s14, %s797_s16, %s798_s13  }
 0x1e8 PF: > { %s470_s21 = sand.u32 1, %s767_s18   ;;  %p1002_p2 = scmp.ge.s32.totalorder %s787_s23, 2 }
 0x1e9   : > { %s471_s30 = scalar_lea.sflag [#allocation4], %s470_s21 }
 0x1ea   : > { %p611_p3 = pnand %p1002_p2, %p887_p11 }
 0x1ec   : > { %p612_p5 = pneg %p611_p3 }
 0x1ee   : > { %762 = dma.done.wait (%p612_p5), %s471_s30, 256  }
 0x1ef   : > { %764 = vsyncadd (%p612_p5), %s471_s30, 4294967040  ;;  %s21_s23 = sadd.s32 1, %s787_s23   ;;  %s1003_s18 = smov %s771_s19 }
 0x1f0   : > { %p18_p6 = scmp.ge.s32.totalorder %s21_s23, 4   ;;  %s1004_s19 = smov %s775_s20 }
 0x1f1   : > { %s1005_s20 = smov %s885_s7  ;;  %s1006_s21 = smov %s783_s22 }
 0x1f2   : > { %s1007_s22 = smov %s1009_s26  ;;  %20 = sbr.rel (!%p18_p6) target bundleno = 6 (0x6), region = 91 }
 0x1f7   :  { %476 = vsyncpa [#allocation3], 1 }
 0x1f8   :  { %478 = vsyncpa [#allocation3 + $0x1], 1 }
 0x1f9   :  { %479 = vsyncpa [#allocation4], 1 }
 0x1fa   :  { %481 = vsyncpa [#allocation4 + $0x1], 1 }

</bundles_post_ra>
